<compile_context>
chip_gen: v5e
topology: v5e:2x2
jax: 0.10.0
libtpu: 0.0.40
codegen_flags: <defaults>
</compile_context>

<pallas_src>
import math

import jax
import jax.numpy as jnp
from jax.experimental import pallas as pl
from jax.experimental.pallas import tpu as pltpu

# Small shapes consistent with the module: d_model=32, h=4 heads, seq=8, batch=2.
D_MODEL = 32
NH = 4
DK = D_MODEL // NH
SEQ = 8
BATCH = 2
M = BATCH * SEQ                      # samples per projection (batch folded in)
SCALE = 1.0 / math.sqrt(DK)


def _mha_attn_kernel(xt_ref, w_ref, b_ref, out_ref):
    """Single step: fused Q/K projection, all-head scores, softmax, one store.

    xt_ref : (D, 2M)   columns 0..M-1 = query samples, M..2M-1 = key samples
    w_ref  : (2D, D)   rows 0..D-1 = SCALE*Wq (out,in), rows D..2D-1 = Wk
    b_ref  : (2D, 1)   [SCALE*bq ; bk]
    out_ref: (B*NH, S, S)  rows ordered (b, h)
    """
    # Fused projection: one MXU push for both linears, bias added in-kernel.
    projT = jnp.dot(w_ref[...], xt_ref[...],
                    preferred_element_type=jnp.float32) + b_ref[...]      # (2D, 2M)

    # Valid blocks: q-projection of the query columns, k-projection of the
    # key columns.  Rows are (head, d_k) — PyTorch's view(..., h, d_k) order.
    qT = projT[0:D_MODEL, 0:M]                    # (D, M), already scaled
    kT = projT[D_MODEL:2 * D_MODEL, M:2 * M]      # (D, M)

    # Head-major without lane slicing: leading-dim split, then a last-two-dims
    # transpose to the flash-attention contraction layout (h, sample, d_k).
    qh = jnp.swapaxes(qT.reshape(NH, DK, M), 1, 2)    # (NH, M, DK)
    kh = jnp.swapaxes(kT.reshape(NH, DK, M), 1, 2)    # (NH, M, DK)

    # All heads, all (q-sample, k-sample) pairs in one batched contraction.
    s = jnp.einsum("hqd,hkd->hqk", qh, kh,
                   preferred_element_type=jnp.float32)        # (NH, M, M)

    # Keep only same-batch (q, k) blocks; leading-dim order becomes (b, h).
    blocks = [s[:, b * SEQ:(b + 1) * SEQ, b * SEQ:(b + 1) * SEQ]
              for b in range(BATCH)]
    sb = jnp.concatenate(blocks, axis=0)                      # (B*NH, S, S)

    # TODO(synk): optional `mask` branch (masked_fill with -1e9) not implemented;
    #             this kernel covers the mask=None path of the module.
    # TODO(synk): nn.Dropout on p_attn is identity in eval mode; train-mode RNG
    #             dropout omitted.

    # Softmax over keys; reciprocal goes to the EUP slot.
    mx = jnp.max(sb, axis=-1, keepdims=True)
    p = jnp.exp(sb - mx)
    denom = jnp.sum(p, axis=-1, keepdims=True)
    out_ref[...] = (p * pl.reciprocal(denom, approx=False)).astype(out_ref.dtype)


def mha_attention(query, key, params):
    """query, key: (B, S, D) f32 -> attention probabilities (B, h, S, S)."""
    B, S, D = query.shape
    assert (B, S, D) == (BATCH, SEQ, D_MODEL)

    # Fold the batch into the matmul M dimension and stack query/key samples
    # as columns of one transposed slab (layout plumbing, done once in XLA).
    xq = query.reshape(B * S, D)
    xk = key.reshape(B * S, D)
    x_all_t = jnp.concatenate([xq, xk], axis=0).T             # (D, 2M)

    out = pl.pallas_call(
        _mha_attn_kernel,
        out_shape=jax.ShapeDtypeStruct((B * NH, S, S), jnp.float32),
        grid=(1,),
        in_specs=[
            pl.BlockSpec((D, 2 * M), lambda i: (0, 0)),        # stacked inputs
            pl.BlockSpec((2 * D, D), lambda i: (0, 0)),        # [SCALE*Wq ; Wk]
            pl.BlockSpec((2 * D, 1), lambda i: (0, 0)),        # [SCALE*bq ; bk]
        ],
        out_specs=pl.BlockSpec((B * NH, S, S), lambda i: (0, 0, 0)),
        compiler_params=pltpu.CompilerParams(
            dimension_semantics=("arbitrary",)),
    )(x_all_t, params["w_qk"], params["b_qk"])

    return out.reshape(B, NH, S, S)


def ref_forward(query, key, raw):
    """Pure-JAX reference mirroring the PyTorch module (mask=None, eval mode)."""
    B, S, D = query.shape
    qp = query @ raw["wq"].T + raw["bq"]                      # nn.Linear semantics
    kp = key @ raw["wk"].T + raw["bk"]
    qh = qp.reshape(B, S, NH, DK).transpose(0, 2, 1, 3)       # (B, h, S, DK)
    kh = kp.reshape(B, S, NH, DK).transpose(0, 2, 1, 3)
    scores = jnp.einsum("bhqd,bhkd->bhqk", qh, kh) / math.sqrt(DK)
    return jax.nn.softmax(scores, axis=-1)


def init_params(key):
    """nn.Linear(d_model, d_model) x2, PyTorch (out,in) layout.

    Returns kernel params (scale folded into the q projection, Q/K stacked)
    and raw params (for the independent pure-JAX reference).
    """
    bound = 1.0 / math.sqrt(D_MODEL)
    ks = jax.random.split(key, 6)
    u = lambda k, shp: jax.random.uniform(k, shp, jnp.float32, -bound, bound)

    wq_pt = u(ks[0], (D_MODEL, D_MODEL))      # (out, in)
    bq = u(ks[1], (D_MODEL,))
    wk_pt = u(ks[2], (D_MODEL, D_MODEL))
    bk = u(ks[3], (D_MODEL,))

    w_qk = jnp.concatenate([wq_pt * SCALE, wk_pt], axis=0)            # (2D, D)
    b_qk = jnp.concatenate([bq * SCALE, bk], axis=0).reshape(2 * D_MODEL, 1)

    kernel_params = {"w_qk": w_qk, "b_qk": b_qk}
    raw_params = {"wq": wq_pt, "bq": bq, "wk": wk_pt, "bk": bk}
    return kernel_params, raw_params, ks[4], ks[5]


if __name__ == "__main__":
    kernel_params, raw_params, q_key, k_key = init_params(jax.random.PRNGKey(0))
    query = jax.random.normal(q_key, (BATCH, SEQ, D_MODEL), jnp.float32)
    key = jax.random.normal(k_key, (BATCH, SEQ, D_MODEL), jnp.float32)

    out = jax.block_until_ready(mha_attention(query, key, kernel_params))
    ref = jax.block_until_ready(ref_forward(query, key, raw_params))

    assert out.shape == (BATCH, NH, SEQ, SEQ)
    assert jnp.allclose(out, ref, atol=2e-5, rtol=2e-5)
    print("KERNEL_OK")
</pallas_src>

<mosaic_0001>
module attributes {stable_mosaic.version = 11 : i64} {
  func.func @_mha_attn_kernel(%arg0: i32, %arg1: memref<32x32xf32, #tpu.memory_space<vmem>>, %arg2: memref<64x32xf32, #tpu.memory_space<vmem>>, %arg3: memref<64x1xf32, #tpu.memory_space<vmem>>, %arg4: memref<8x8x8xf32, #tpu.memory_space<vmem>>) attributes {dimension_semantics = [#tpu.dimension_semantics<arbitrary>], iteration_bounds = array<i64: 1>, scalar_prefetch = 0 : i64, scratch_operands = 0 : i64, tpu.core_type = #tpu.core_type<tc>, window_params = [{pipeline_mode = #tpu.pipeline_mode<synchronous>, transform_indices = @transform_0, window_bounds = array<i64: 32, 32>}, {pipeline_mode = #tpu.pipeline_mode<synchronous>, transform_indices = @transform_1, window_bounds = array<i64: 64, 32>}, {pipeline_mode = #tpu.pipeline_mode<synchronous>, transform_indices = @transform_2, window_bounds = array<i64: 64, 1>}, {pipeline_mode = #tpu.pipeline_mode<synchronous>, transform_indices = @transform_3, window_bounds = array<i64: 8, 8, 8>}]} {
    %c0 = arith.constant 0 : index
    %c0_0 = arith.constant 0 : index
    %0 = vector.load %arg2[%c0, %c0_0] : memref<64x32xf32, #tpu.memory_space<vmem>>, vector<64x32xf32>
    %c0_1 = arith.constant 0 : index
    %c0_2 = arith.constant 0 : index
    %1 = vector.load %arg1[%c0_1, %c0_2] : memref<32x32xf32, #tpu.memory_space<vmem>>, vector<32x32xf32>
    %cst = arith.constant dense<0.000000e+00> : vector<64x32xf32>
    %2 = tpu.matmul %0, %1, %cst {dimension_numbers = #tpu.dot_dimension_numbers<[1], [0], [0], [1], [0, 0, 1, 1], [], []>} : vector<64x32xf32>, vector<32x32xf32>, vector<64x32xf32> -> vector<64x32xf32>
    %c0_3 = arith.constant 0 : index
    %c0_4 = arith.constant 0 : index
    %3 = vector.load %arg3[%c0_3, %c0_4] : memref<64x1xf32, #tpu.memory_space<vmem>>, vector<64x1xf32>
    %4 = vector.broadcast %3 : vector<64x1xf32> to vector<64x32xf32>
    %5 = arith.addf %2, %4 : vector<64x32xf32>
    %6 = vector.extract_strided_slice %5 {offsets = [0, 0], sizes = [32, 16], strides = [1, 1]} : vector<64x32xf32> to vector<32x16xf32>
    %7 = vector.extract_strided_slice %5 {offsets = [32, 16], sizes = [32, 16], strides = [1, 1]} : vector<64x32xf32> to vector<32x16xf32>
    %8 = vector.shape_cast %6 : vector<32x16xf32> to vector<4x8x16xf32>
    %9 = tpu.transpose %8, [0, 2, 1] : vector<4x8x16xf32> -> vector<4x16x8xf32>
    %10 = vector.shape_cast %7 : vector<32x16xf32> to vector<4x8x16xf32>
    %11 = tpu.transpose %10, [0, 2, 1] : vector<4x8x16xf32> -> vector<4x16x8xf32>
    "tpu.trace_start"() <{level = 10 : i32, message = "hqd,hkd->hqk"}> : () -> ()
    %cst_5 = arith.constant dense<0.000000e+00> : vector<4x16x16xf32>
    %12 = tpu.matmul %9, %11, %cst_5 {dimension_numbers = #tpu.dot_dimension_numbers<[2], [2], [1], [1], [0, 0, 0, 1, 1, 1], [0], [0]>} : vector<4x16x8xf32>, vector<4x16x8xf32>, vector<4x16x16xf32> -> vector<4x16x16xf32>
    "tpu.trace_stop"() : () -> ()
    %13 = vector.extract_strided_slice %12 {offsets = [0, 0, 0], sizes = [4, 8, 8], strides = [1, 1, 1]} : vector<4x16x16xf32> to vector<4x8x8xf32>
    %14 = vector.extract_strided_slice %12 {offsets = [0, 8, 8], sizes = [4, 8, 8], strides = [1, 1, 1]} : vector<4x16x16xf32> to vector<4x8x8xf32>
    %15 = tpu.concatenate %13, %14 in 0 : vector<4x8x8xf32>, vector<4x8x8xf32> -> vector<8x8x8xf32>
    %cst_6 = arith.constant dense<0xFF800000> : vector<8x8xf32>
    %16 = vector.multi_reduction <maximumf>, %15, %cst_6 [2] : vector<8x8x8xf32> to vector<8x8xf32>
    %17 = vector.shape_cast %16 : vector<8x8xf32> to vector<8x8x1xf32>
    %18 = vector.broadcast %17 : vector<8x8x1xf32> to vector<8x8x8xf32>
    %19 = arith.subf %15, %18 : vector<8x8x8xf32>
    %20 = math.exp %19 : vector<8x8x8xf32>
    %cst_7 = arith.constant dense<0.000000e+00> : vector<8x8xf32>
    %21 = vector.multi_reduction <add>, %20, %cst_7 [2] : vector<8x8x8xf32> to vector<8x8xf32>
    %22 = vector.shape_cast %21 : vector<8x8xf32> to vector<8x8x1xf32>
    %23 = tpu.reciprocal %22 : vector<8x8x1xf32> -> vector<8x8x1xf32>
    %24 = vector.broadcast %23 : vector<8x8x1xf32> to vector<8x8x8xf32>
    %25 = arith.mulf %20, %24 : vector<8x8x8xf32>
    %c0_8 = arith.constant 0 : index
    %c0_9 = arith.constant 0 : index
    %c0_10 = arith.constant 0 : index
    %26 = vector.load %arg4[%c0_8, %c0_9, %c0_10] : memref<8x8x8xf32, #tpu.memory_space<vmem>>, vector<8x8x8xf32>
    tpu.vector_store %arg4[%c0_8, %c0_9, %c0_10], %25 {strides = array<i32>} : memref<8x8x8xf32, #tpu.memory_space<vmem>>, vector<8x8x8xf32>,
    return
  }
  func.func @transform_0(%arg0: i32) -> (i32, i32) {
    %c0_i32 = arith.constant 0 : i32
    %c0_i32_0 = arith.constant 0 : i32
    %c0_i32_1 = arith.constant 0 : i32
    return %c0_i32, %c0_i32_0 : i32, i32
  }
  func.func @transform_1(%arg0: i32) -> (i32, i32) {
    %c0_i32 = arith.constant 0 : i32
    %c0_i32_0 = arith.constant 0 : i32
    %c0_i32_1 = arith.constant 0 : i32
    return %c0_i32, %c0_i32_0 : i32, i32
  }
  func.func @transform_2(%arg0: i32) -> (i32, i32) {
    %c0_i32 = arith.constant 0 : i32
    %c0_i32_0 = arith.constant 0 : i32
    %c0_i32_1 = arith.constant 0 : i32
    return %c0_i32, %c0_i32_0 : i32, i32
  }
  func.func @transform_3(%arg0: i32) -> (i32, i32, i32) {
    %c0_i32 = arith.constant 0 : i32
    %c0_i32_0 = arith.constant 0 : i32
    %c0_i32_1 = arith.constant 0 : i32
    %c0_i32_2 = arith.constant 0 : i32
    return %c0_i32, %c0_i32_0, %c0_i32_1 : i32, i32, i32
  }
}

</mosaic_0001>

<bundles_post_ra>
// kernel: tpu_custom_call.1
= control target key start
LH: loop header
LB: loop body
LE: loop exit
PB: predicated region body
PF: predicated region fallthrough
CT: control target
= control target key end

     0   :  { %v733_v3 = vmov 0   ;;  %vm75_vm0 = vcmask 261120   ;;  %s894_s0 = inlined_call_operand.vmem [shape: f32[32,32], index: 0, kind: input, shape index: {}]   ;;  %s895_s1 = inlined_call_operand.vmem [shape: f32[64,32], index: 1, kind: input, shape index: {}]   ;;  %s896_s2 = inlined_call_operand.vmem [shape: f32[64,1], index: 2, kind: input, shape index: {}]   ;;  %s897_s3 = inlined_call_operand.hbm [shape: f32[8,8,8], index: 3, kind: output, shape index: {}]  }
   0x1   :  { %v26_v0 = vld [vmem:[%s894_s0 + $0x18] sm:$0xff]  ;;  %v25_v1 = vld [vmem:[%s894_s0 + $0x10] sm:$0xff]  ;;  %v24_v2 = vld [vmem:[%s894_s0 + $0x8] sm:$0xff]  ;;  %668 = vset.pattern.permute.xlu1 %v733_v3  ;;  %667 = vset.pattern.permute.xlu0 %v733_v3 }
   0x2   :  { %112 = vmatpush.msra.mxu0 %v26_v0  ;;  %652 = vmatpush.msra.mxu2 %v26_v0  ;;  %v33_v4 = vld [vmem:[%s896_s2 + $0x30] sm:$0xff]  ;;  %v23_v5 = vld [vmem:[%s894_s0] sm:$0xff] }
   0x3   :  { %653 = vmatpush.msra.mxu3 %v26_v0  ;;  %67 = vperm.xlu1 %668, %v33_v4   ;;  %v15_v6 = vld [vmem:[%s895_s1] sm:$0xff]  ;;  %v21_v8 = vld [vmem:[%s895_s1 + $0x30] sm:$0xff] }
   0x4   :  { %113 = vmatpush.msra.mxu0 %v25_v1  ;;  %654 = vmatpush.msra.mxu2 %v25_v1  ;;  %v19_v7 = vld [vmem:[%s895_s1 + $0x20] sm:$0xff] }
   0x5   :  { %655 = vmatpush.msra.mxu3 %v25_v1 }
   0x6   :  { %114 = vmatpush.msra.mxu0 %v24_v2  ;;  %656 = vmatpush.msra.mxu2 %v24_v2 }
   0x7   :  { %657 = vmatpush.msra.mxu3 %v24_v2 }
   0x8   :  { %8 = vsyncpa [#allocation3], 0  ;;  %115 = vmatpush.msra.mxu0 %v23_v5  ;;  %658 = vmatpush.msra.mxu2 %v23_v5  ;;  %v31_v9 = vld [vmem:[%s896_s2 + $0x20] sm:$0xff]  ;;  %v34_v11 = vld [vmem:[%s896_s2 + $0x38] sm:$0xff]  ;;  %s734_s24 = smov 112   ;;  %vm273_vm1 = vcmask 64512  }
   0x9   :  { %659 = vmatpush.msra.mxu3 %v23_v5  ;;  %636 = vmatmul.msk.f32.vlgmr.msra.gmra.mxu0 %vm75_vm0, %v15_v6  ;;  %v27_v10 = vld [vmem:[%s896_s2] sm:$0xff]  ;;  %v16_v12 = vld [vmem:[%s895_s1 + $0x8] sm:$0xff]  ;;  %v22_v14 = vld [vmem:[%s895_s1 + $0x38] sm:$0xff]  ;;  %s624_s0 = sshll.u32 %s897_s3, 4  ;;  %s737_s28 = smov 128   ;;  %s625_s0 = int_to_ptr.hbm [resolvable:$true] %s624_s0 }
   0xa   :  { %640 = vmatmul.msk.f32.vlgmr.msra.gmra.mxu2 %vm75_vm0, %v19_v7  ;;  %642 = vmatmul.msk.f32.vlgmr.msra.gmra.mxu3 %vm75_vm0, %v21_v8  ;;  %v20_v13 = vld [vmem:[%s895_s1 + $0x28] sm:$0xff]  ;;  %v30_v17 = vld [vmem:[%s896_s2 + $0x18] sm:$0xff]  ;;  %v17_v18 = vld [vmem:[%s895_s1 + $0x10] sm:$0xff]  ;;  %s738_s29 = smov 8  }
   0xb   :  { %57 = vperm.xlu0 %667, %v31_v9   ;;  %669 = vset.pattern.permute.xlu2 %v733_v3  ;;  %v32_v15 = vld [vmem:[%s896_s2 + $0x28] sm:$0xff]  ;;  %v29_v19 = vld [vmem:[%s896_s2 + $0x10] sm:$0xff]  ;;  %v18_v20 = vld [vmem:[%s895_s1 + $0x18] sm:$0xff]  ;;  %s735_s1 = smov 120  }
   0xc   :  { %37 = vperm.xlu2 %669, %v27_v10   ;;  %72 = vperm.xlu1 %668, %v34_v11   ;;  %v28_v16 = vld [vmem:[%s896_s2 + $0x8] sm:$0xff]  ;;  %s736_s2 = smov [#allocation2]  }
   0xd   :  { %s622_s25 = sshll.u32 %s736_s2, 4  ;;  %s623_s25 = int_to_ptr.vmem [resolvable:$true] %s622_s25 }
  0x11   :  { %637 = vmatmul.msk.f32.gmra.mxu0 %vm75_vm0, %v16_v12 }
  0x12   :  { %641 = vmatmul.msk.f32.gmra.mxu2 %vm75_vm0, %v20_v13  ;;  %643 = vmatmul.msk.f32.gmra.mxu3 %vm75_vm0, %v22_v14 }
  0x13   :  { %62 = vperm.xlu0 %667, %v32_v15  }
  0x14   :  { %42 = vperm.xlu2 %669, %v28_v16   ;;  %52 = vperm.xlu1 %668, %v30_v17  }
  0x19   :  { %638 = vmatmul.msk.f32.gmra.mxu0 %vm75_vm0, %v17_v18 }
  0x1b   :  { %47 = vperm.xlu0 %667, %v29_v19  }
  0x21   :  { %639 = vmatmul.msk.f32.gmra.mxu0 %vm75_vm0, %v18_v20 }
  0x66   :  { %v38_v35 = vpop.permute.xlu2 %37 }
  0x6e   :  { %v43_v38 = vpop.permute.xlu2 %42 }
  0x75   :  { %v68_v22 = vpop.permute.xlu1 %67 }
  0x7d   :  { %v58_v21 = vpop.permute.xlu0 %57 }
  0x7e   :  { %v73_v27 = vpop.permute.xlu1 %72 }
  0x85   :  { %v63_v26 = vpop.permute.xlu0 %62 }
  0x86   :  { %v117_v34 = vpop.f32.mrf.mxu0  ;;  %v53_v42 = vpop.permute.xlu1 %52 }
  0x87   :  { %v118_v37 = vadd.f32 %v117_v34, %v38_v35 }
  0x8d   :  { %v129_v23 = vpop.f32.mrf.mxu2  ;;  %v135_v24 = vpop.f32.mrf.mxu3 }
  0x8e   :  { %v130_v25 = vadd.f32 %v129_v23, %v58_v21  ;;  %v136_v30 = vadd.f32 %v135_v24, %v68_v22  ;;  %v120_v36 = vpop.f32.mrf.mxu0  ;;  %v48_v44 = vpop.permute.xlu0 %47 }
  0x8f   :  { %v121_v40 = vadd.f32 %v120_v36, %v43_v38 }
  0x90   :  { %270 = vrot.lane.b32.xlu2 %v130_v25, %s734_s24 }
  0x95   :  { %v132_v28 = vpop.f32.mrf.mxu2  ;;  %v138_v29 = vpop.f32.mrf.mxu3 }
  0x96   :  { %v133_v31 = vadd.f32 %v132_v28, %v63_v26  ;;  %v139_v32 = vadd.f32 %v138_v29, %v73_v27  ;;  %v123_v39 = vpop.f32.mrf.mxu0 }
  0x97   :  { %v124_v45 = vadd.f32 %v123_v39, %v48_v44 }
  0x98   :  { %v670_v33 = vpack.i.bf16 %v136_v30, %v133_v31  ;;  %370 = vrot.lane.b32.xlu1 %v139_v32, %s734_s24 }
  0x9a   :  { %671 = vrot.lane.b32.xlu0 %v670_v33, %s734_s24 }
  0x9e   :  { %v126_v41 = vpop.f32.mrf.mxu0 }
  0x9f   :  { %v127_v43 = vadd.f32 %v126_v41, %v53_v42 }
  0xb6   :  { %141 = vxpose.xlu2.b32.start.end [1/1] (short) (narrow) %v118_v37, 16 }
  0xbc   :  { %173 = vxpose.xlu0.b32.start.end [1/1] (short) (narrow) %v121_v40, 16 }
  0xc6   :  { %237 = vxpose.xlu2.b32.start.end [1/1] (short) (narrow) %v127_v43, 16 }
  0xcd   :  { %205 = vxpose.xlu1.b32.start.end [1/1] (short) (narrow) %v124_v45, 16 }
  0xea   :  { %v271_v46 = vpop.permute.xlu2 %270 }
  0xeb   :  { %295 = vmatpush.msra.mxu1 %v271_v46 }
 0x10a   :  { %v371_v47 = vpop.permute.xlu1 %370 }
 0x10b   :  { %394 = vmatpush.msrb.mxu1 %v371_v47 }
 0x10c   :  { %v672_v48 = vpop.permute.xlu0 %671 }
 0x10d   :  { %v673_v49 = vunpack.i.l.bf16 %v672_v48  ;;  %v674_v50 = vunpack.i.h.bf16 %v672_v48 }
 0x10f   :  { %328 = vmatpush.msrb.mxu2 %v673_v49  ;;  %361 = vmatpush.msrb.mxu3 %v674_v50 }
 0x14f   :  { %v157_v51 = vpop.trf.xlu2 }
 0x150   :  { %644 = vmatmul.msk.f32.vlgmr.msra.gmra.mxu1 %vm273_vm1, %v157_v51 }
 0x157   :  { %v158_v52 = vpop.trf.xlu2 }
 0x158   :  { %645 = vmatmul.msk.f32.gmra.mxu1 %vm273_vm1, %v158_v52 }
 0x15f   :  { %v253_v53 = vpop.trf.xlu2 }
 0x160   :  { %v189_v54 = vpop.trf.xlu0  ;;  %650 = vmatmul.msk.f32.vlgmr.msrb.gmra.mxu1 %vm273_vm1, %v253_v53 }
 0x161   :  { %646 = vmatmul.msk.f32.vlgmr.msrb.gmra.mxu2 %vm273_vm1, %v189_v54 }
 0x167   :  { %v254_v55 = vpop.trf.xlu2 }
 0x168   :  { %v190_v56 = vpop.trf.xlu0  ;;  %651 = vmatmul.msk.f32.gmra.mxu1 %vm273_vm1, %v254_v55 }
 0x169   :  { %647 = vmatmul.msk.f32.gmra.mxu2 %vm273_vm1, %v190_v56 }
 0x171   :  { %v221_v57 = vpop.trf.xlu1 }
 0x172   :  { %648 = vmatmul.msk.f32.vlgmr.msrb.gmra.mxu3 %vm273_vm1, %v221_v57 }
 0x179   :  { %v222_v58 = vpop.trf.xlu1 }
 0x17a   :  { %649 = vmatmul.msk.f32.gmra.mxu3 %vm273_vm1, %v222_v58 }
 0x1cd   :  { %v297_v59 = vpop.f32.mrf.mxu1 }
 0x1ce   :  { %v418_v2 = vsel %vm273_vm1, %v297_v59, -inf }
 0x1d5   :  { %v300_v60 = vpop.f32.mrf.mxu1 }
 0x1d6   :  { %406 = vrot.lane.b32.xlu0 %v300_v60, %s735_s1 }
 0x1dd   :  { %v396_v0 = vpop.f32.mrf.mxu1 }
 0x1de   :  { %v427_v4 = vsel %vm273_vm1, %v396_v0, -inf }
 0x1e4   :  { %v330_v61 = vpop.f32.mrf.mxu2 }
 0x1e5   :  { %v399_v3 = vpop.f32.mrf.mxu1  ;;  %v421_v6 = vsel %vm273_vm1, %v330_v61, -inf }
 0x1ec   :  { %v333_v62 = vpop.f32.mrf.mxu2 }
 0x1ed   :  { %408 = vrot.lane.b32.xlu2 %v333_v62, %s735_s1 }
 0x1f5   :  { %v363_v63 = vpop.f32.mrf.mxu3 }
 0x1f6   :  { %v424_v5 = vsel %vm273_vm1, %v363_v63, -inf }
 0x1fd   :  { %v366_v1 = vpop.f32.mrf.mxu3 }
 0x1fe   :  { %410 = vrot.lane.b32.xlu1 %v366_v1, %s735_s1 }
 0x200   :  { %419 = vmax.xlane.f32.xlu0 %v418_v2 }
 0x206   :  { %412 = vrot.lane.b32.xlu1 %v399_v3, %s735_s1 }
 0x208   :  { %428 = vmax.xlane.f32.xlu0 %v427_v4 }
 0x216   :  { %425 = vmax.xlane.f32.xlu2 %v424_v5 }
 0x230   :  { %422 = vmax.xlane.f32.xlu1 %v421_v6 }
 0x247   :  { %v409_v7 = vpop.permute.xlu2 %408 }
 0x248   :  { %v407_v8 = vpop.permute.xlu0 %406  ;;  %v433_v9 = vsel %vm273_vm1, %v409_v7, -inf }
 0x249   :  { %434 = vmax.xlane.f32.xlu1 %v433_v9  ;;  %v430_v10 = vsel %vm273_vm1, %v407_v8, -inf }
 0x24a   :  { %431 = vmax.xlane.f32.xlu2 %v430_v10 }
 0x270   :  { %v411_v11 = vpop.permute.xlu1 %410 }
 0x271   :  { %v436_v12 = vsel %vm273_vm1, %v411_v11, -inf }
 0x272   :  { %437 = vmax.xlane.f32.xlu0 %v436_v12 }
 0x273   :  { %v420_v13 = vpop.xlane.xlu0 %419 }
 0x274   :  { %v442_v14 = vsub.f32 %v297_v59, %v420_v13 }
 0x276   :  { %v450_v15 = vmul.f32 1.442695, %v442_v14 }
 0x278   :  { %675 = vpow2.f32 %v450_v15  ;;  %v413_v16 = vpop.permute.xlu1 %412 }
 0x279   :  { %v439_v17 = vsel %vm273_vm1, %v413_v16, -inf }
 0x27a   :  { %440 = vmax.xlane.f32.xlu2 %v439_v17 }
 0x27b   :  { %v429_v18 = vpop.xlane.xlu0 %428 }
 0x27c   :  { %v445_v19 = vsub.f32 %v396_v0, %v429_v18 }
 0x27e   :  { %v843_v20 = vpop.eup %675  ;;  %v456_v21 = vmul.f32 1.442695, %v445_v19 }
 0x27f   :  { %v466_v22 = vsel %vm273_vm1, %v843_v20, 0.0 }
 0x280   :  { %677 = vpow2.f32 %v456_v21  ;;  %467 = vadd.xlane.f32.xlu1 %v466_v22 }
 0x286   :  { %v847_v23 = vpop.eup %677 }
 0x287   :  { %v475_v24 = vsel %vm273_vm1, %v847_v23, 0.0 }
 0x288   :  { %476 = vadd.xlane.f32.xlu1 %v475_v24 }
 0x289   :  { %v426_v25 = vpop.xlane.xlu2 %425 }
 0x28a   :  { %v444_v26 = vsub.f32 %v363_v63, %v426_v25 }
 0x28c   :  { %v454_v27 = vmul.f32 1.442695, %v444_v26 }
 0x28e   :  { %679 = vpow2.f32 %v454_v27 }
 0x294   :  { %v851_v28 = vpop.eup %679 }
 0x295   :  { %v472_v29 = vsel %vm273_vm1, %v851_v28, 0.0 }
 0x296   :  { %473 = vadd.xlane.f32.xlu2 %v472_v29 }
 0x2a3   :  { %v423_v30 = vpop.xlane.xlu1 %422 }
 0x2a4   :  { %v443_v31 = vsub.f32 %v330_v61, %v423_v30 }
 0x2a6   :  { %v452_v32 = vmul.f32 1.442695, %v443_v31 }
 0x2a8   :  { %681 = vpow2.f32 %v452_v32 }
 0x2ae   :  { %v855_v33 = vpop.eup %681 }
 0x2af   :  { %v469_v34 = vsel %vm273_vm1, %v855_v33, 0.0 }
 0x2b0   :  { %470 = vadd.xlane.f32.xlu0 %v469_v34 }
 0x2bc   :  { %v435_v35 = vpop.xlane.xlu1 %434 }
 0x2bd   :  { %v447_v36 = vsub.f32 %v409_v7, %v435_v35  ;;  %v432_v37 = vpop.xlane.xlu2 %431 }
 0x2be   :  { %v446_v38 = vsub.f32 %v407_v8, %v432_v37 }
 0x2bf   :  { %v460_v39 = vmul.f32 1.442695, %v447_v36 }
 0x2c0   :  { %v458_v40 = vmul.f32 1.442695, %v446_v38 }
 0x2c1   :  { %683 = vpow2.f32 %v460_v39 }
 0x2c2   :  { %685 = vpow2.f32 %v458_v40 }
 0x2c7   :  { %v859_v41 = vpop.eup %683 }
 0x2c8   :  { %v861_v42 = vpop.eup %685  ;;  %v481_v43 = vsel %vm273_vm1, %v859_v41, 0.0 }
 0x2c9   :  { %482 = vadd.xlane.f32.xlu2 %v481_v43  ;;  %v478_v44 = vsel %vm273_vm1, %v861_v42, 0.0 }
 0x2ca   :  { %479 = vadd.xlane.f32.xlu0 %v478_v44 }
 0x2e5   :  { %v438_v45 = vpop.xlane.xlu0 %437 }
 0x2e6   :  { %v448_v46 = vsub.f32 %v411_v11, %v438_v45 }
 0x2e8   :  { %v462_v47 = vmul.f32 1.442695, %v448_v46 }
 0x2ea   :  { %687 = vpow2.f32 %v462_v47 }
 0x2ed   :  { %v441_v48 = vpop.xlane.xlu2 %440 }
 0x2ee   :  { %v449_v49 = vsub.f32 %v413_v16, %v441_v48 }
 0x2f0   :  { %v867_v50 = vpop.eup %687  ;;  %v464_v51 = vmul.f32 1.442695, %v449_v49 }
 0x2f1   :  { %v484_v52 = vsel %vm273_vm1, %v867_v50, 0.0 }
 0x2f2   :  { %689 = vpow2.f32 %v464_v51  ;;  %485 = vadd.xlane.f32.xlu1 %v484_v52 }
 0x2f3   :  { %v468_v53 = vpop.xlane.xlu1 %467 }
 0x2f4   :  { %691 = vrcp.f32 %v468_v53  ;;  %v501_v60 = vand.u32 2147483648, %v468_v53  ;;  %v499_v62 = vand.u32 2147483647, %v468_v53  ;;  %vm495_vm3 = vweird.f32 %v468_v53 }
 0x2f6   :  { %v502_v1 = vor.u32 1.1754944e-38, %v501_v60  ;;  %vm500_vm5 = vcmp.eq.f32.partialorder %v499_v62, 8.507059e+37 }
 0x2f8   :  { %v871_v54 = vpop.eup %689 }
 0x2f9   :  { %v487_v55 = vsel %vm273_vm1, %v871_v54, 0.0 }
 0x2fa   :  { %v692_v56 = vpop.eup %691  ;;  %488 = vadd.xlane.f32.xlu0 %v487_v55 }
 0x2fb   :  { %v491_v57 = vmul.f32 %v692_v56, %v468_v53  ;;  %v477_v58 = vpop.xlane.xlu1 %476  ;;  %vm496_vm2 = vweird.f32 %v692_v56 }
 0x2fc   :  { %693 = vrcp.f32 %v477_v58  ;;  %vm497_vm4 = vmor %vm495_vm3, %vm496_vm2  ;;  %v543_v7 = vand.u32 2147483648, %v477_v58  ;;  %v541_v9 = vand.u32 2147483647, %v477_v58  ;;  %vm537_vm7 = vweird.f32 %v477_v58 }
 0x2fd   :  { %v492_v59 = vsub.f32 1.0, %v491_v57 }
 0x2fe   :  { %v544_v12 = vor.u32 1.1754944e-38, %v543_v7  ;;  %vm542_vm9 = vcmp.eq.f32.partialorder %v541_v9, 8.507059e+37 }
 0x2ff   :  { %v493_v61 = vmul.f32 %v692_v56, %v492_v59 }
 0x301   :  { %v494_v63 = vadd.f32 %v692_v56, %v493_v61 }
 0x302   :  { %v694_v0 = vpop.eup %693 }
 0x303   :  { %v498_v2 = vsel %vm497_vm4, %v692_v56, %v494_v63  ;;  %v533_v3 = vmul.f32 %v694_v0, %v477_v58  ;;  %vm538_vm6 = vweird.f32 %v694_v0 }
 0x304   :  { %v503_v4 = vsel %vm500_vm5, %v502_v1, %v498_v2  ;;  %vm539_vm8 = vmor %vm537_vm7, %vm538_vm6 }
 0x305   :  { %v602_v5 = vmul.f32 %v843_v20, %v503_v4  ;;  %v534_v6 = vsub.f32 1.0, %v533_v3 }
 0x307   :  { %610 = vst.msk [vmem:[#allocation2] sm:$0xff] %vm273_vm1, %v602_v5  ;;  %v535_v8 = vmul.f32 %v694_v0, %v534_v6 }
 0x309   :  { %v536_v10 = vadd.f32 %v694_v0, %v535_v8  ;;  %v474_v11 = vpop.xlane.xlu2 %473 }
 0x30a   :  { %695 = vrcp.f32 %v474_v11  ;;  %v529_v19 = vand.u32 2147483648, %v474_v11  ;;  %v527_v21 = vand.u32 2147483647, %v474_v11  ;;  %vm523_vm11 = vweird.f32 %v474_v11 }
 0x30b   :  { %v540_v13 = vsel %vm539_vm8, %v694_v0, %v536_v10 }
 0x30c   :  { %v545_v14 = vsel %vm542_vm9, %v544_v12, %v540_v13  ;;  %v530_v24 = vor.u32 1.1754944e-38, %v529_v19  ;;  %vm528_vm13 = vcmp.eq.f32.partialorder %v527_v21, 8.507059e+37 }
 0x30d   :  { %v605_v15 = vmul.f32 %v847_v23, %v545_v14 }
 0x30f   :  { %613 = vst.msk [vmem:[#allocation2 + $0x18] sm:$0xff] %vm273_vm1, %v605_v15 }
 0x310   :  { %v696_v16 = vpop.eup %695 }
 0x311   :  { %v519_v17 = vmul.f32 %v696_v16, %v474_v11  ;;  %vm524_vm10 = vweird.f32 %v696_v16 }
 0x312   :  { %vm525_vm12 = vmor %vm523_vm11, %vm524_vm10 }
 0x313   :  { %v520_v18 = vsub.f32 1.0, %v519_v17 }
 0x315   :  { %v521_v20 = vmul.f32 %v696_v16, %v520_v18 }
 0x317   :  { %v522_v22 = vadd.f32 %v696_v16, %v521_v20 }
 0x319   :  { %v526_v25 = vsel %vm525_vm12, %v696_v16, %v522_v22 }
 0x31a   :  { %v531_v26 = vsel %vm528_vm13, %v530_v24, %v526_v25 }
 0x31b   :  { %v604_v27 = vmul.f32 %v851_v28, %v531_v26 }
 0x31d   :  { %612 = vst.msk [vmem:[#allocation2 + $0x10] sm:$0xff] %vm273_vm1, %v604_v27 }
 0x323   :  { %v471_v23 = vpop.xlane.xlu0 %470 }
 0x324   :  { %697 = vrcp.f32 %v471_v23  ;;  %v515_v32 = vand.u32 2147483648, %v471_v23  ;;  %v513_v35 = vand.u32 2147483647, %v471_v23  ;;  %vm509_vm15 = vweird.f32 %v471_v23 }
 0x326   :  { %v516_v37 = vor.u32 1.1754944e-38, %v515_v32  ;;  %vm514_vm2 = vcmp.eq.f32.partialorder %v513_v35, 8.507059e+37 }
 0x32a   :  { %v698_v29 = vpop.eup %697 }
 0x32b   :  { %v505_v30 = vmul.f32 %v698_v29, %v471_v23  ;;  %vm510_vm14 = vweird.f32 %v698_v29 }
 0x32c   :  { %vm511_vm0 = vmor %vm509_vm15, %vm510_vm14 }
 0x32d   :  { %v506_v31 = vsub.f32 1.0, %v505_v30 }
 0x32f   :  { %v507_v34 = vmul.f32 %v698_v29, %v506_v31 }
 0x331   :  { %v508_v36 = vadd.f32 %v698_v29, %v507_v34 }
 0x333   :  { %v512_v38 = vsel %vm511_vm0, %v698_v29, %v508_v36 }
 0x334   :  { %v517_v39 = vsel %vm514_vm2, %v516_v37, %v512_v38 }
 0x335   :  { %v603_v28 = vmul.f32 %v855_v33, %v517_v39 }
 0x337   :  { %611 = vst.msk [vmem:[#allocation2 + $0x8] sm:$0xff] %vm273_vm1, %v603_v28 }
 0x33c   :  { %v483_v40 = vpop.xlane.xlu2 %482 }
 0x33d   :  { %699 = vrcp.f32 %v483_v40  ;;  %v480_v43 = vpop.xlane.xlu0 %479  ;;  %v571_v49 = vand.u32 2147483648, %v483_v40  ;;  %v569_v53 = vand.u32 2147483647, %v483_v40  ;;  %vm565_vm5 = vweird.f32 %v483_v40 }
 0x33e   :  { %701 = vrcp.f32 %v480_v43  ;;  %v557_v55 = vand.u32 2147483648, %v480_v43  ;;  %v555_v33 = vand.u32 2147483647, %v480_v43  ;;  %vm551_vm7 = vweird.f32 %v480_v43 }
 0x33f   :  { %v572_v58 = vor.u32 1.1754944e-38, %v571_v49  ;;  %vm570_vm8 = vcmp.eq.f32.partialorder %v569_v53, 8.507059e+37 }
 0x340   :  { %v558_v61 = vor.u32 1.1754944e-38, %v557_v55  ;;  %vm556_vm10 = vcmp.eq.f32.partialorder %v555_v33, 8.507059e+37 }
 0x343   :  { %v700_v44 = vpop.eup %699 }
 0x344   :  { %v702_v45 = vpop.eup %701  ;;  %v561_v46 = vmul.f32 %v700_v44, %v483_v40  ;;  %vm566_vm3 = vweird.f32 %v700_v44 }
 0x345   :  { %v547_v47 = vmul.f32 %v702_v45, %v480_v43  ;;  %vm552_vm4 = vweird.f32 %v702_v45  ;;  %vm567_vm6 = vmor %vm565_vm5, %vm566_vm3 }
 0x346   :  { %v562_v48 = vsub.f32 1.0, %v561_v46  ;;  %vm553_vm9 = vmor %vm551_vm7, %vm552_vm4 }
 0x347   :  { %v548_v51 = vsub.f32 1.0, %v547_v47 }
 0x348   :  { %v563_v52 = vmul.f32 %v700_v44, %v562_v48 }
 0x349   :  { %v549_v56 = vmul.f32 %v702_v45, %v548_v51 }
 0x34a   :  { %v564_v57 = vadd.f32 %v700_v44, %v563_v52 }
 0x34b   :  { %v550_v59 = vadd.f32 %v702_v45, %v549_v56 }
 0x34c   :  { %v568_v60 = vsel %vm567_vm6, %v700_v44, %v564_v57 }
 0x34d   :  { %v573_v62 = vsel %vm570_vm8, %v572_v58, %v568_v60  ;;  %v554_v63 = vsel %vm553_vm9, %v702_v45, %v550_v59 }
 0x34e   :  { %v607_v0 = vmul.f32 %v859_v41, %v573_v62  ;;  %v559_v1 = vsel %vm556_vm10, %v558_v61, %v554_v63 }
 0x34f   :  { %v606_v2 = vmul.f32 %v861_v42, %v559_v1 }
 0x350   :  { %615 = vst.msk [vmem:[#allocation2 + $0x28] sm:$0xff] %vm273_vm1, %v607_v0 }
 0x351   :  { %614 = vst.msk [vmem:[#allocation2 + $0x20] sm:$0xff] %vm273_vm1, %v606_v2 }
 0x365   :  { %v486_v3 = vpop.xlane.xlu1 %485 }
 0x366   :  { %703 = vrcp.f32 %v486_v3  ;;  %v585_v8 = vand.u32 2147483648, %v486_v3  ;;  %v583_v10 = vand.u32 2147483647, %v486_v3  ;;  %vm579_vm12 = vweird.f32 %v486_v3 }
 0x368   :  { %v586_v42 = vor.u32 1.1754944e-38, %v585_v8  ;;  %vm584_vm14 = vcmp.eq.f32.partialorder %v583_v10, 8.507059e+37 }
 0x36c   :  { %v704_v4 = vpop.eup %703 }
 0x36d   :  { %v575_v5 = vmul.f32 %v704_v4, %v486_v3  ;;  %v489_v6 = vpop.xlane.xlu0 %488  ;;  %vm580_vm11 = vweird.f32 %v704_v4 }
 0x36e   :  { %705 = vrcp.f32 %v489_v6  ;;  %vm581_vm13 = vmor %vm579_vm12, %vm580_vm11  ;;  %v599_v17 = vand.u32 2147483648, %v489_v6  ;;  %v597_v19 = vand.u32 2147483647, %v489_v6  ;;  %vm593_vm0 = vweird.f32 %v489_v6 }
 0x36f   :  { %v576_v7 = vsub.f32 1.0, %v575_v5 }
 0x370   :  { %v600_v21 = vor.u32 1.1754944e-38, %v599_v17  ;;  %vm598_vm3 = vcmp.eq.f32.partialorder %v597_v19, 8.507059e+37 }
 0x371   :  { %v577_v9 = vmul.f32 %v704_v4, %v576_v7 }
 0x373   :  { %v578_v11 = vadd.f32 %v704_v4, %v577_v9 }
 0x374   :  { %v706_v41 = vpop.eup %705 }
 0x375   :  { %v582_v12 = vsel %vm581_vm13, %v704_v4, %v578_v11  ;;  %v589_v13 = vmul.f32 %v706_v41, %v489_v6  ;;  %vm594_vm15 = vweird.f32 %v706_v41 }
 0x376   :  { %v587_v14 = vsel %vm584_vm14, %v586_v42, %v582_v12  ;;  %vm595_vm2 = vmor %vm593_vm0, %vm594_vm15 }
 0x377   :  { %v608_v15 = vmul.f32 %v867_v50, %v587_v14  ;;  %v590_v16 = vsub.f32 1.0, %v589_v13 }
 0x379   :  { %616 = vst.msk [vmem:[#allocation2 + $0x30] sm:$0xff] %vm273_vm1, %v608_v15  ;;  %v591_v18 = vmul.f32 %v706_v41, %v590_v16 }
 0x37b   :  { %v592_v20 = vadd.f32 %v706_v41, %v591_v18 }
 0x37d   :  { %v596_v22 = vsel %vm595_vm2, %v706_v41, %v592_v20 }
 0x37e   :  { %v601_v50 = vsel %vm598_vm3, %v600_v21, %v596_v22 }
 0x37f   :  { %v609_v24 = vmul.f32 %v871_v54, %v601_v50 }
 0x381   :  { %617 = vst.msk [vmem:[#allocation2 + $0x38] sm:$0xff] %vm273_vm1, %v609_v24 }
 0x382   :  { %630 = dma.vmem_to_hbm [thread:$0]  %s623_s25, 1024, %s625_s0, [#allocation3], %s737_s28, %s737_s28, %s738_s29  }
 0x383   :  { %731 = dma.done.wait [#allocation3], 1024  }
 0x384   :  { %732 = vsyncadd [#allocation3], 4294966272 }
 0x385   :  { %635 = vsyncpa [#allocation3], 1 }

</bundles_post_ra>
